<compile_context>
chip_gen: v7x
topology: tpu7x:2x2x1
jax: 0.10.0
libtpu: 0.0.40
codegen_flags: <defaults>
</compile_context>

<pallas_src>
import functools
import math

import jax
import jax.numpy as jnp
from jax.experimental import pallas as pl
from jax.experimental.pallas import tpu as pltpu

_ISSUE_UNROLL = 8  # tile_n is always a multiple of 8


def _token_embed_kernel(ids_ref, table_hbm, out_ref, gather_buf, sems, *,
                        tile_n, n_inner, n_tiles, scale):
    # ids_ref:     (n_pad,)            int32, SMEM (scalar prefetch)
    # table_hbm:   (vocab, d_pad)      HBM ref (pl.ANY) -- DMA gather source
    # out_ref:     (tile_n, d_pad)     VMEM output tile
    # gather_buf:  (2, tile_n, d_pad)  VMEM double-buffered gather target
    # sems:        (2,)                one shared DMA semaphore per slot
    p = pl.program_id(0)        # "parallel": sharded across TensorCores (v7x)
    j = pl.program_id(1)        # "arbitrary": sequential per core
    tile = p * n_inner + j      # global tile index
    slot = j % 2
    nxt = 1 - slot

    def issue(tile_idx, slot_idx):
        # Clamp is defensive only; the prefetch call sits under a pl.when that
        # already guarantees tile_idx < n_tiles at runtime.
        base = jnp.minimum(tile_idx, n_tiles - 1) * tile_n

        # Partially unrolled issue loop: 8 row DMAs per loop iteration, all
        # signalling the same semaphore (one bulk wait later).
        @pl.loop(0, tile_n // _ISSUE_UNROLL)
        def _(g):
            row0 = g * _ISSUE_UNROLL
            for u in range(_ISSUE_UNROLL):          # static unroll
                i = row0 + u
                tok = ids_ref[base + i]             # cheap SMEM scalar read
                pltpu.make_async_copy(table_hbm.at[tok],
                                      gather_buf.at[slot_idx, i],
                                      sems.at[slot_idx]).start()

    # Prime this core's pipeline on its first step.
    @pl.when(j == 0)
    def _():
        issue(tile, slot)

    # Prefetch the next tile into the other slot BEFORE blocking on the
    # current one, so its row DMAs overlap the wait + scale + writeback below.
    @pl.when(j + 1 < n_inner)
    def _():
        issue(tile + 1, nxt)

    # Single bulk wait: every row copy signalled sems[slot]; this descriptor's
    # byte count (full slot buffer) equals the sum of the row copies. The src
    # here is only a shape-matching dummy -- wait() uses dst + semaphore.
    pltpu.make_async_copy(gather_buf.at[nxt], gather_buf.at[slot],
                          sems.at[slot]).wait()

    # Scale by sqrt(d_model) on the VPU; Pallas pipelines the HBM writeback.
    # TODO(synk): for bf16/int8 tables a u32-bitcast gather would keep row DMAs
    # at full rate; f32 rows are already full 32-bit sublanes.
    out_ref[...] = (gather_buf[slot] * scale).astype(out_ref.dtype)


def token_embedding(ids, table, *, tile_n=256):
    """ids: int array (any shape); table: (vocab, d_model).

    Returns embeddings of shape ids.shape + (d_model,), scaled by sqrt(d_model).
    """
    vocab, d_model = table.shape
    lead_shape = ids.shape
    N = int(math.prod(lead_shape)) if lead_shape else 1

    def _round_up(x, m):
        return (x + m - 1) // m * m

    # Lane-dense rows: pad d_model up to a multiple of 128 (sliced off below).
    d_pad = _round_up(d_model, 128)
    table_p = table if d_pad == d_model else jnp.pad(
        table, ((0, 0), (0, d_pad - d_model)))

    # Tile size: multiple of 8, large enough to amortize per-step overhead but
    # capped so the grid always has >= 2 tiles (v7x megacore sharding).
    tile_n = max(8, _round_up(tile_n, 8))
    tile_n = min(tile_n, max(8, _round_up((N + 1) // 2, 8)))
    n_pad = _round_up(N, 2 * tile_n)     # even number of tiles
    n_tiles = n_pad // tile_n
    n_inner = n_tiles // 2

    # Flatten, clamp (jnp.take-style) and pad the ids.
    # TODO(synk): PyTorch nn.Embedding raises on out-of-range ids; we clamp.
    ids_flat = jnp.clip(ids.reshape(-1).astype(jnp.int32), 0, vocab - 1)
    if n_pad != N:
        ids_flat = jnp.pad(ids_flat, (0, n_pad - N))   # pad tokens gather row 0

    scale = float(math.sqrt(d_model))
    kernel = functools.partial(_token_embed_kernel, tile_n=tile_n,
                               n_inner=n_inner, n_tiles=n_tiles, scale=scale)

    itemsize = jnp.dtype(table.dtype).itemsize
    tile_bytes = tile_n * d_pad * itemsize
    # 2 gather slots + ~2 pipelined output tiles, with headroom; demo -> 32 MiB.
    vmem_limit = int(max(32 * 1024 * 1024, min(96 * 1024 * 1024, 6 * tile_bytes)))

    out_flat = pl.pallas_call(
        kernel,
        out_shape=jax.ShapeDtypeStruct((n_pad, d_pad), table.dtype),
        grid_spec=pltpu.PrefetchScalarGridSpec(
            num_scalar_prefetch=1,                          # ids land in SMEM
            grid=(2, n_inner),
            in_specs=[pl.BlockSpec(memory_space=pl.ANY)],   # table stays in HBM
            out_specs=pl.BlockSpec(
                (tile_n, d_pad), lambda p, j, ids: (p * n_inner + j, 0)),
            scratch_shapes=[
                pltpu.VMEM((2, tile_n, d_pad), table.dtype),  # gather slots
                pltpu.SemaphoreType.DMA((2,)),                # one sem per slot
            ],
        ),
        compiler_params=pltpu.CompilerParams(
            dimension_semantics=("parallel", "arbitrary"),
            vmem_limit_bytes=vmem_limit,
        ),
    )(ids_flat, table_p)

    return out_flat[:N, :d_model].reshape(*lead_shape, d_model)


if __name__ == "__main__":
    # Small deterministic setup consistent with the module.
    vocab_size = 64
    d_model = 32
    B, S = 2, 8

    key = jax.random.PRNGKey(0)
    k_table, k_ids = jax.random.split(key)

    # nn.Embedding default init ~ N(0, 1); deterministic synthetic weights.
    table = jax.random.normal(k_table, (vocab_size, d_model), dtype=jnp.float32)
    x = jax.random.randint(k_ids, (B, S), 0, vocab_size, dtype=jnp.int32)

    out = token_embedding(x, table)
    jax.block_until_ready(out)

    # Reference check: pure-JAX gather * sqrt(d_model).
    ref = jnp.take(table, x, axis=0) * math.sqrt(d_model)
    assert out.shape == (B, S, d_model)
    assert jnp.allclose(out, ref, atol=1e-5, rtol=1e-5)

    print("KERNEL_OK")
</pallas_src>

<mosaic_0001>
module attributes {stable_mosaic.version = 11 : i64} {
  func.func @_token_embed_kernel(%arg0: i32, %arg1: i32, %arg2: memref<16xi32, #tpu.memory_space<smem>>, %arg3: memref<64x128xf32, #tpu.memory_space<any>>, %arg4: memref<8x128xf32, #tpu.memory_space<vmem>>, %arg5: memref<2x8x128xf32, #tpu.memory_space<vmem>>, %arg6: memref<2x!tpu.dma_semaphore, #tpu.memory_space<semaphore_mem>>) attributes {dimension_semantics = [#tpu.dimension_semantics<parallel>, #tpu.dimension_semantics<arbitrary>], iteration_bounds = array<i64: 2, 1>, scalar_prefetch = 1 : i64, scratch_operands = 2 : i64, tpu.core_type = #tpu.core_type<tc>, window_params = [{}, {transform_indices = @transform_1, window_bounds = array<i64: 8, 128>}]} {
    %c1_i32 = arith.constant 1 : i32
    %0 = arith.muli %arg0, %c1_i32 : i32
    %1 = arith.addi %0, %arg1 : i32
    %c2_i32 = arith.constant 2 : i32
    %c0_i32 = arith.constant 0 : i32
    %2 = arith.cmpi eq, %c2_i32, %c0_i32 : i32
    %c1_i32_0 = arith.constant 1 : i32
    %3 = arith.select %2, %c1_i32_0, %c2_i32 : i32
    %4 = arith.remsi %arg1, %3 : i32
    %c0_i32_1 = arith.constant 0 : i32
    %5 = arith.cmpi ne, %4, %c0_i32_1 : i32
    %c0_i32_2 = arith.constant 0 : i32
    %6 = arith.cmpi slt, %4, %c0_i32_2 : i32
    %c0_i32_3 = arith.constant 0 : i32
    %7 = arith.cmpi slt, %3, %c0_i32_3 : i32
    %8 = arith.xori %6, %7 : i1
    %9 = arith.andi %8, %5 : i1
    %10 = arith.addi %4, %3 : i32
    %11 = arith.select %9, %10, %4 : i32
    %c1_i32_4 = arith.constant 1 : i32
    %12 = arith.subi %c1_i32_4, %11 : i32
    %c0_i32_5 = arith.constant 0 : i32
    %13 = arith.cmpi eq, %arg1, %c0_i32_5 : i32
    %14 = arith.extui %13 : i1 to i32
    %c0_i32_6 = arith.constant 0 : i32
    %15 = arith.cmpi ne, %14, %c0_i32_6 : i32
    scf.if %15 {
      %c1_i32_17 = arith.constant 1 : i32
      %32 = arith.minsi %1, %c1_i32_17 : i32
      %c8_i32 = arith.constant 8 : i32
      %33 = arith.muli %32, %c8_i32 : i32
      %c0_i32_18 = arith.constant 0 : i32
      %c1_i32_19 = arith.constant 1 : i32
      %34 = arith.muli %c0_i32_18, %c1_i32_19 : i32
      %c0_i32_20 = arith.constant 0 : i32
      %35 = arith.addi %c0_i32_20, %34 : i32
      %c8_i32_21 = arith.constant 8 : i32
      %36 = arith.muli %35, %c8_i32_21 : i32
      %c0_i32_22 = arith.constant 0 : i32
      %37 = arith.addi %36, %c0_i32_22 : i32
      %38 = arith.addi %33, %37 : i32
      %39 = arith.index_cast %38 : i32 to index
      %40 = memref.load %arg2[%39] : memref<16xi32, #tpu.memory_space<smem>>
      %c0_i32_23 = arith.constant 0 : i32
      %41 = tpu.memref_slice %arg3[%40, %c0_i32_23] : memref<64x128xf32, #tpu.memory_space<any>> -> memref<1x128xf32, #tpu.memory_space<any>>
      %42 = tpu.memref_squeeze %41 : memref<1x128xf32, #tpu.memory_space<any>> -> memref<128xf32, #tpu.memory_space<any>>
      %c0_i32_24 = arith.constant 0 : i32
      %43 = tpu.memref_slice %arg5[%11, %37, %c0_i32_24] : memref<2x8x128xf32, #tpu.memory_space<vmem>> -> memref<1x1x128xf32, #tpu.memory_space<vmem>>
      %44 = tpu.memref_squeeze %43 : memref<1x1x128xf32, #tpu.memory_space<vmem>> -> memref<128xf32, #tpu.memory_space<vmem>>
      %45 = tpu.memref_slice %arg6[%11] : memref<2x!tpu.dma_semaphore, #tpu.memory_space<semaphore_mem>> -> memref<1x!tpu.dma_semaphore, #tpu.memory_space<semaphore_mem>>
      %46 = tpu.memref_squeeze %45 : memref<1x!tpu.dma_semaphore, #tpu.memory_space<semaphore_mem>> -> memref<!tpu.dma_semaphore, #tpu.memory_space<semaphore_mem>>
      tpu.enqueue_dma source(%42 : memref<128xf32, #tpu.memory_space<any>>) target(%44 : memref<128xf32, #tpu.memory_space<vmem>>) target_semaphore(%46 : memref<!tpu.dma_semaphore, #tpu.memory_space<semaphore_mem>>)
      %c1_i32_25 = arith.constant 1 : i32
      %47 = arith.addi %36, %c1_i32_25 : i32
      %48 = arith.addi %33, %47 : i32
      %49 = arith.index_cast %48 : i32 to index
      %50 = memref.load %arg2[%49] : memref<16xi32, #tpu.memory_space<smem>>
      %c0_i32_26 = arith.constant 0 : i32
      %51 = tpu.memref_slice %arg3[%50, %c0_i32_26] : memref<64x128xf32, #tpu.memory_space<any>> -> memref<1x128xf32, #tpu.memory_space<any>>
      %52 = tpu.memref_squeeze %51 : memref<1x128xf32, #tpu.memory_space<any>> -> memref<128xf32, #tpu.memory_space<any>>
      %c0_i32_27 = arith.constant 0 : i32
      %53 = tpu.memref_slice %arg5[%11, %47, %c0_i32_27] : memref<2x8x128xf32, #tpu.memory_space<vmem>> -> memref<1x1x128xf32, #tpu.memory_space<vmem>>
      %54 = tpu.memref_squeeze %53 : memref<1x1x128xf32, #tpu.memory_space<vmem>> -> memref<128xf32, #tpu.memory_space<vmem>>
      %55 = tpu.memref_slice %arg6[%11] : memref<2x!tpu.dma_semaphore, #tpu.memory_space<semaphore_mem>> -> memref<1x!tpu.dma_semaphore, #tpu.memory_space<semaphore_mem>>
      %56 = tpu.memref_squeeze %55 : memref<1x!tpu.dma_semaphore, #tpu.memory_space<semaphore_mem>> -> memref<!tpu.dma_semaphore, #tpu.memory_space<semaphore_mem>>
      tpu.enqueue_dma source(%52 : memref<128xf32, #tpu.memory_space<any>>) target(%54 : memref<128xf32, #tpu.memory_space<vmem>>) target_semaphore(%56 : memref<!tpu.dma_semaphore, #tpu.memory_space<semaphore_mem>>)
      %c2_i32_28 = arith.constant 2 : i32
      %57 = arith.addi %36, %c2_i32_28 : i32
      %58 = arith.addi %33, %57 : i32
      %59 = arith.index_cast %58 : i32 to index
      %60 = memref.load %arg2[%59] : memref<16xi32, #tpu.memory_space<smem>>
      %c0_i32_29 = arith.constant 0 : i32
      %61 = tpu.memref_slice %arg3[%60, %c0_i32_29] : memref<64x128xf32, #tpu.memory_space<any>> -> memref<1x128xf32, #tpu.memory_space<any>>
      %62 = tpu.memref_squeeze %61 : memref<1x128xf32, #tpu.memory_space<any>> -> memref<128xf32, #tpu.memory_space<any>>
      %c0_i32_30 = arith.constant 0 : i32
      %63 = tpu.memref_slice %arg5[%11, %57, %c0_i32_30] : memref<2x8x128xf32, #tpu.memory_space<vmem>> -> memref<1x1x128xf32, #tpu.memory_space<vmem>>
      %64 = tpu.memref_squeeze %63 : memref<1x1x128xf32, #tpu.memory_space<vmem>> -> memref<128xf32, #tpu.memory_space<vmem>>
      %65 = tpu.memref_slice %arg6[%11] : memref<2x!tpu.dma_semaphore, #tpu.memory_space<semaphore_mem>> -> memref<1x!tpu.dma_semaphore, #tpu.memory_space<semaphore_mem>>
      %66 = tpu.memref_squeeze %65 : memref<1x!tpu.dma_semaphore, #tpu.memory_space<semaphore_mem>> -> memref<!tpu.dma_semaphore, #tpu.memory_space<semaphore_mem>>
      tpu.enqueue_dma source(%62 : memref<128xf32, #tpu.memory_space<any>>) target(%64 : memref<128xf32, #tpu.memory_space<vmem>>) target_semaphore(%66 : memref<!tpu.dma_semaphore, #tpu.memory_space<semaphore_mem>>)
      %c3_i32 = arith.constant 3 : i32
      %67 = arith.addi %36, %c3_i32 : i32
      %68 = arith.addi %33, %67 : i32
      %69 = arith.index_cast %68 : i32 to index
      %70 = memref.load %arg2[%69] : memref<16xi32, #tpu.memory_space<smem>>
      %c0_i32_31 = arith.constant 0 : i32
      %71 = tpu.memref_slice %arg3[%70, %c0_i32_31] : memref<64x128xf32, #tpu.memory_space<any>> -> memref<1x128xf32, #tpu.memory_space<any>>
      %72 = tpu.memref_squeeze %71 : memref<1x128xf32, #tpu.memory_space<any>> -> memref<128xf32, #tpu.memory_space<any>>
      %c0_i32_32 = arith.constant 0 : i32
      %73 = tpu.memref_slice %arg5[%11, %67, %c0_i32_32] : memref<2x8x128xf32, #tpu.memory_space<vmem>> -> memref<1x1x128xf32, #tpu.memory_space<vmem>>
      %74 = tpu.memref_squeeze %73 : memref<1x1x128xf32, #tpu.memory_space<vmem>> -> memref<128xf32, #tpu.memory_space<vmem>>
      %75 = tpu.memref_slice %arg6[%11] : memref<2x!tpu.dma_semaphore, #tpu.memory_space<semaphore_mem>> -> memref<1x!tpu.dma_semaphore, #tpu.memory_space<semaphore_mem>>
      %76 = tpu.memref_squeeze %75 : memref<1x!tpu.dma_semaphore, #tpu.memory_space<semaphore_mem>> -> memref<!tpu.dma_semaphore, #tpu.memory_space<semaphore_mem>>
      tpu.enqueue_dma source(%72 : memref<128xf32, #tpu.memory_space<any>>) target(%74 : memref<128xf32, #tpu.memory_space<vmem>>) target_semaphore(%76 : memref<!tpu.dma_semaphore, #tpu.memory_space<semaphore_mem>>)
      %c4_i32 = arith.constant 4 : i32
      %77 = arith.addi %36, %c4_i32 : i32
      %78 = arith.addi %33, %77 : i32
      %79 = arith.index_cast %78 : i32 to index
      %80 = memref.load %arg2[%79] : memref<16xi32, #tpu.memory_space<smem>>
      %c0_i32_33 = arith.constant 0 : i32
      %81 = tpu.memref_slice %arg3[%80, %c0_i32_33] : memref<64x128xf32, #tpu.memory_space<any>> -> memref<1x128xf32, #tpu.memory_space<any>>
      %82 = tpu.memref_squeeze %81 : memref<1x128xf32, #tpu.memory_space<any>> -> memref<128xf32, #tpu.memory_space<any>>
      %c0_i32_34 = arith.constant 0 : i32
      %83 = tpu.memref_slice %arg5[%11, %77, %c0_i32_34] : memref<2x8x128xf32, #tpu.memory_space<vmem>> -> memref<1x1x128xf32, #tpu.memory_space<vmem>>
      %84 = tpu.memref_squeeze %83 : memref<1x1x128xf32, #tpu.memory_space<vmem>> -> memref<128xf32, #tpu.memory_space<vmem>>
      %85 = tpu.memref_slice %arg6[%11] : memref<2x!tpu.dma_semaphore, #tpu.memory_space<semaphore_mem>> -> memref<1x!tpu.dma_semaphore, #tpu.memory_space<semaphore_mem>>
      %86 = tpu.memref_squeeze %85 : memref<1x!tpu.dma_semaphore, #tpu.memory_space<semaphore_mem>> -> memref<!tpu.dma_semaphore, #tpu.memory_space<semaphore_mem>>
      tpu.enqueue_dma source(%82 : memref<128xf32, #tpu.memory_space<any>>) target(%84 : memref<128xf32, #tpu.memory_space<vmem>>) target_semaphore(%86 : memref<!tpu.dma_semaphore, #tpu.memory_space<semaphore_mem>>)
      %c5_i32 = arith.constant 5 : i32
      %87 = arith.addi %36, %c5_i32 : i32
      %88 = arith.addi %33, %87 : i32
      %89 = arith.index_cast %88 : i32 to index
      %90 = memref.load %arg2[%89] : memref<16xi32, #tpu.memory_space<smem>>
      %c0_i32_35 = arith.constant 0 : i32
      %91 = tpu.memref_slice %arg3[%90, %c0_i32_35] : memref<64x128xf32, #tpu.memory_space<any>> -> memref<1x128xf32, #tpu.memory_space<any>>
      %92 = tpu.memref_squeeze %91 : memref<1x128xf32, #tpu.memory_space<any>> -> memref<128xf32, #tpu.memory_space<any>>
      %c0_i32_36 = arith.constant 0 : i32
      %93 = tpu.memref_slice %arg5[%11, %87, %c0_i32_36] : memref<2x8x128xf32, #tpu.memory_space<vmem>> -> memref<1x1x128xf32, #tpu.memory_space<vmem>>
      %94 = tpu.memref_squeeze %93 : memref<1x1x128xf32, #tpu.memory_space<vmem>> -> memref<128xf32, #tpu.memory_space<vmem>>
      %95 = tpu.memref_slice %arg6[%11] : memref<2x!tpu.dma_semaphore, #tpu.memory_space<semaphore_mem>> -> memref<1x!tpu.dma_semaphore, #tpu.memory_space<semaphore_mem>>
      %96 = tpu.memref_squeeze %95 : memref<1x!tpu.dma_semaphore, #tpu.memory_space<semaphore_mem>> -> memref<!tpu.dma_semaphore, #tpu.memory_space<semaphore_mem>>
      tpu.enqueue_dma source(%92 : memref<128xf32, #tpu.memory_space<any>>) target(%94 : memref<128xf32, #tpu.memory_space<vmem>>) target_semaphore(%96 : memref<!tpu.dma_semaphore, #tpu.memory_space<semaphore_mem>>)
      %c6_i32 = arith.constant 6 : i32
      %97 = arith.addi %36, %c6_i32 : i32
      %98 = arith.addi %33, %97 : i32
      %99 = arith.index_cast %98 : i32 to index
      %100 = memref.load %arg2[%99] : memref<16xi32, #tpu.memory_space<smem>>
      %c0_i32_37 = arith.constant 0 : i32
      %101 = tpu.memref_slice %arg3[%100, %c0_i32_37] : memref<64x128xf32, #tpu.memory_space<any>> -> memref<1x128xf32, #tpu.memory_space<any>>
      %102 = tpu.memref_squeeze %101 : memref<1x128xf32, #tpu.memory_space<any>> -> memref<128xf32, #tpu.memory_space<any>>
      %c0_i32_38 = arith.constant 0 : i32
      %103 = tpu.memref_slice %arg5[%11, %97, %c0_i32_38] : memref<2x8x128xf32, #tpu.memory_space<vmem>> -> memref<1x1x128xf32, #tpu.memory_space<vmem>>
      %104 = tpu.memref_squeeze %103 : memref<1x1x128xf32, #tpu.memory_space<vmem>> -> memref<128xf32, #tpu.memory_space<vmem>>
      %105 = tpu.memref_slice %arg6[%11] : memref<2x!tpu.dma_semaphore, #tpu.memory_space<semaphore_mem>> -> memref<1x!tpu.dma_semaphore, #tpu.memory_space<semaphore_mem>>
      %106 = tpu.memref_squeeze %105 : memref<1x!tpu.dma_semaphore, #tpu.memory_space<semaphore_mem>> -> memref<!tpu.dma_semaphore, #tpu.memory_space<semaphore_mem>>
      tpu.enqueue_dma source(%102 : memref<128xf32, #tpu.memory_space<any>>) target(%104 : memref<128xf32, #tpu.memory_space<vmem>>) target_semaphore(%106 : memref<!tpu.dma_semaphore, #tpu.memory_space<semaphore_mem>>)
      %c7_i32 = arith.constant 7 : i32
      %107 = arith.addi %36, %c7_i32 : i32
      %108 = arith.addi %33, %107 : i32
      %109 = arith.index_cast %108 : i32 to index
      %110 = memref.load %arg2[%109] : memref<16xi32, #tpu.memory_space<smem>>
      %c0_i32_39 = arith.constant 0 : i32
      %111 = tpu.memref_slice %arg3[%110, %c0_i32_39] : memref<64x128xf32, #tpu.memory_space<any>> -> memref<1x128xf32, #tpu.memory_space<any>>
      %112 = tpu.memref_squeeze %111 : memref<1x128xf32, #tpu.memory_space<any>> -> memref<128xf32, #tpu.memory_space<any>>
      %c0_i32_40 = arith.constant 0 : i32
      %113 = tpu.memref_slice %arg5[%11, %107, %c0_i32_40] : memref<2x8x128xf32, #tpu.memory_space<vmem>> -> memref<1x1x128xf32, #tpu.memory_space<vmem>>
      %114 = tpu.memref_squeeze %113 : memref<1x1x128xf32, #tpu.memory_space<vmem>> -> memref<128xf32, #tpu.memory_space<vmem>>
      %115 = tpu.memref_slice %arg6[%11] : memref<2x!tpu.dma_semaphore, #tpu.memory_space<semaphore_mem>> -> memref<1x!tpu.dma_semaphore, #tpu.memory_space<semaphore_mem>>
      %116 = tpu.memref_squeeze %115 : memref<1x!tpu.dma_semaphore, #tpu.memory_space<semaphore_mem>> -> memref<!tpu.dma_semaphore, #tpu.memory_space<semaphore_mem>>
      tpu.enqueue_dma source(%112 : memref<128xf32, #tpu.memory_space<any>>) target(%114 : memref<128xf32, #tpu.memory_space<vmem>>) target_semaphore(%116 : memref<!tpu.dma_semaphore, #tpu.memory_space<semaphore_mem>>)
      %c1_i32_41 = arith.constant 1 : i32
    } else {
    }
    %c1_i32_7 = arith.constant 1 : i32
    %16 = arith.addi %arg1, %c1_i32_7 : i32
    %c1_i32_8 = arith.constant 1 : i32
    %17 = arith.cmpi slt, %16, %c1_i32_8 : i32
    %18 = arith.extui %17 : i1 to i32
    %c0_i32_9 = arith.constant 0 : i32
    %19 = arith.cmpi ne, %18, %c0_i32_9 : i32
    scf.if %19 {
      %c1_i32_17 = arith.constant 1 : i32
      %32 = arith.addi %1, %c1_i32_17 : i32
      %c1_i32_18 = arith.constant 1 : i32
      %33 = arith.minsi %32, %c1_i32_18 : i32
      %c8_i32 = arith.constant 8 : i32
      %34 = arith.muli %33, %c8_i32 : i32
      %c0_i32_19 = arith.constant 0 : i32
      %c1_i32_20 = arith.constant 1 : i32
      %35 = arith.muli %c0_i32_19, %c1_i32_20 : i32
      %c0_i32_21 = arith.constant 0 : i32
      %36 = arith.addi %c0_i32_21, %35 : i32
      %c8_i32_22 = arith.constant 8 : i32
      %37 = arith.muli %36, %c8_i32_22 : i32
      %c0_i32_23 = arith.constant 0 : i32
      %38 = arith.addi %37, %c0_i32_23 : i32
      %39 = arith.addi %34, %38 : i32
      %40 = arith.index_cast %39 : i32 to index
      %41 = memref.load %arg2[%40] : memref<16xi32, #tpu.memory_space<smem>>
      %c0_i32_24 = arith.constant 0 : i32
      %42 = tpu.memref_slice %arg3[%41, %c0_i32_24] : memref<64x128xf32, #tpu.memory_space<any>> -> memref<1x128xf32, #tpu.memory_space<any>>
      %43 = tpu.memref_squeeze %42 : memref<1x128xf32, #tpu.memory_space<any>> -> memref<128xf32, #tpu.memory_space<any>>
      %c0_i32_25 = arith.constant 0 : i32
      %44 = tpu.memref_slice %arg5[%12, %38, %c0_i32_25] : memref<2x8x128xf32, #tpu.memory_space<vmem>> -> memref<1x1x128xf32, #tpu.memory_space<vmem>>
      %45 = tpu.memref_squeeze %44 : memref<1x1x128xf32, #tpu.memory_space<vmem>> -> memref<128xf32, #tpu.memory_space<vmem>>
      %46 = tpu.memref_slice %arg6[%12] : memref<2x!tpu.dma_semaphore, #tpu.memory_space<semaphore_mem>> -> memref<1x!tpu.dma_semaphore, #tpu.memory_space<semaphore_mem>>
      %47 = tpu.memref_squeeze %46 : memref<1x!tpu.dma_semaphore, #tpu.memory_space<semaphore_mem>> -> memref<!tpu.dma_semaphore, #tpu.memory_space<semaphore_mem>>
      tpu.enqueue_dma source(%43 : memref<128xf32, #tpu.memory_space<any>>) target(%45 : memref<128xf32, #tpu.memory_space<vmem>>) target_semaphore(%47 : memref<!tpu.dma_semaphore, #tpu.memory_space<semaphore_mem>>)
      %c1_i32_26 = arith.constant 1 : i32
      %48 = arith.addi %37, %c1_i32_26 : i32
      %49 = arith.addi %34, %48 : i32
      %50 = arith.index_cast %49 : i32 to index
      %51 = memref.load %arg2[%50] : memref<16xi32, #tpu.memory_space<smem>>
      %c0_i32_27 = arith.constant 0 : i32
      %52 = tpu.memref_slice %arg3[%51, %c0_i32_27] : memref<64x128xf32, #tpu.memory_space<any>> -> memref<1x128xf32, #tpu.memory_space<any>>
      %53 = tpu.memref_squeeze %52 : memref<1x128xf32, #tpu.memory_space<any>> -> memref<128xf32, #tpu.memory_space<any>>
      %c0_i32_28 = arith.constant 0 : i32
      %54 = tpu.memref_slice %arg5[%12, %48, %c0_i32_28] : memref<2x8x128xf32, #tpu.memory_space<vmem>> -> memref<1x1x128xf32, #tpu.memory_space<vmem>>
      %55 = tpu.memref_squeeze %54 : memref<1x1x128xf32, #tpu.memory_space<vmem>> -> memref<128xf32, #tpu.memory_space<vmem>>
      %56 = tpu.memref_slice %arg6[%12] : memref<2x!tpu.dma_semaphore, #tpu.memory_space<semaphore_mem>> -> memref<1x!tpu.dma_semaphore, #tpu.memory_space<semaphore_mem>>
      %57 = tpu.memref_squeeze %56 : memref<1x!tpu.dma_semaphore, #tpu.memory_space<semaphore_mem>> -> memref<!tpu.dma_semaphore, #tpu.memory_space<semaphore_mem>>
      tpu.enqueue_dma source(%53 : memref<128xf32, #tpu.memory_space<any>>) target(%55 : memref<128xf32, #tpu.memory_space<vmem>>) target_semaphore(%57 : memref<!tpu.dma_semaphore, #tpu.memory_space<semaphore_mem>>)
      %c2_i32_29 = arith.constant 2 : i32
      %58 = arith.addi %37, %c2_i32_29 : i32
      %59 = arith.addi %34, %58 : i32
      %60 = arith.index_cast %59 : i32 to index
      %61 = memref.load %arg2[%60] : memref<16xi32, #tpu.memory_space<smem>>
      %c0_i32_30 = arith.constant 0 : i32
      %62 = tpu.memref_slice %arg3[%61, %c0_i32_30] : memref<64x128xf32, #tpu.memory_space<any>> -> memref<1x128xf32, #tpu.memory_space<any>>
      %63 = tpu.memref_squeeze %62 : memref<1x128xf32, #tpu.memory_space<any>> -> memref<128xf32, #tpu.memory_space<any>>
      %c0_i32_31 = arith.constant 0 : i32
      %64 = tpu.memref_slice %arg5[%12, %58, %c0_i32_31] : memref<2x8x128xf32, #tpu.memory_space<vmem>> -> memref<1x1x128xf32, #tpu.memory_space<vmem>>
      %65 = tpu.memref_squeeze %64 : memref<1x1x128xf32, #tpu.memory_space<vmem>> -> memref<128xf32, #tpu.memory_space<vmem>>
      %66 = tpu.memref_slice %arg6[%12] : memref<2x!tpu.dma_semaphore, #tpu.memory_space<semaphore_mem>> -> memref<1x!tpu.dma_semaphore, #tpu.memory_space<semaphore_mem>>
      %67 = tpu.memref_squeeze %66 : memref<1x!tpu.dma_semaphore, #tpu.memory_space<semaphore_mem>> -> memref<!tpu.dma_semaphore, #tpu.memory_space<semaphore_mem>>
      tpu.enqueue_dma source(%63 : memref<128xf32, #tpu.memory_space<any>>) target(%65 : memref<128xf32, #tpu.memory_space<vmem>>) target_semaphore(%67 : memref<!tpu.dma_semaphore, #tpu.memory_space<semaphore_mem>>)
      %c3_i32 = arith.constant 3 : i32
      %68 = arith.addi %37, %c3_i32 : i32
      %69 = arith.addi %34, %68 : i32
      %70 = arith.index_cast %69 : i32 to index
      %71 = memref.load %arg2[%70] : memref<16xi32, #tpu.memory_space<smem>>
      %c0_i32_32 = arith.constant 0 : i32
      %72 = tpu.memref_slice %arg3[%71, %c0_i32_32] : memref<64x128xf32, #tpu.memory_space<any>> -> memref<1x128xf32, #tpu.memory_space<any>>
      %73 = tpu.memref_squeeze %72 : memref<1x128xf32, #tpu.memory_space<any>> -> memref<128xf32, #tpu.memory_space<any>>
      %c0_i32_33 = arith.constant 0 : i32
      %74 = tpu.memref_slice %arg5[%12, %68, %c0_i32_33] : memref<2x8x128xf32, #tpu.memory_space<vmem>> -> memref<1x1x128xf32, #tpu.memory_space<vmem>>
      %75 = tpu.memref_squeeze %74 : memref<1x1x128xf32, #tpu.memory_space<vmem>> -> memref<128xf32, #tpu.memory_space<vmem>>
      %76 = tpu.memref_slice %arg6[%12] : memref<2x!tpu.dma_semaphore, #tpu.memory_space<semaphore_mem>> -> memref<1x!tpu.dma_semaphore, #tpu.memory_space<semaphore_mem>>
      %77 = tpu.memref_squeeze %76 : memref<1x!tpu.dma_semaphore, #tpu.memory_space<semaphore_mem>> -> memref<!tpu.dma_semaphore, #tpu.memory_space<semaphore_mem>>
      tpu.enqueue_dma source(%73 : memref<128xf32, #tpu.memory_space<any>>) target(%75 : memref<128xf32, #tpu.memory_space<vmem>>) target_semaphore(%77 : memref<!tpu.dma_semaphore, #tpu.memory_space<semaphore_mem>>)
      %c4_i32 = arith.constant 4 : i32
      %78 = arith.addi %37, %c4_i32 : i32
      %79 = arith.addi %34, %78 : i32
      %80 = arith.index_cast %79 : i32 to index
      %81 = memref.load %arg2[%80] : memref<16xi32, #tpu.memory_space<smem>>
      %c0_i32_34 = arith.constant 0 : i32
      %82 = tpu.memref_slice %arg3[%81, %c0_i32_34] : memref<64x128xf32, #tpu.memory_space<any>> -> memref<1x128xf32, #tpu.memory_space<any>>
      %83 = tpu.memref_squeeze %82 : memref<1x128xf32, #tpu.memory_space<any>> -> memref<128xf32, #tpu.memory_space<any>>
      %c0_i32_35 = arith.constant 0 : i32
      %84 = tpu.memref_slice %arg5[%12, %78, %c0_i32_35] : memref<2x8x128xf32, #tpu.memory_space<vmem>> -> memref<1x1x128xf32, #tpu.memory_space<vmem>>
      %85 = tpu.memref_squeeze %84 : memref<1x1x128xf32, #tpu.memory_space<vmem>> -> memref<128xf32, #tpu.memory_space<vmem>>
      %86 = tpu.memref_slice %arg6[%12] : memref<2x!tpu.dma_semaphore, #tpu.memory_space<semaphore_mem>> -> memref<1x!tpu.dma_semaphore, #tpu.memory_space<semaphore_mem>>
      %87 = tpu.memref_squeeze %86 : memref<1x!tpu.dma_semaphore, #tpu.memory_space<semaphore_mem>> -> memref<!tpu.dma_semaphore, #tpu.memory_space<semaphore_mem>>
      tpu.enqueue_dma source(%83 : memref<128xf32, #tpu.memory_space<any>>) target(%85 : memref<128xf32, #tpu.memory_space<vmem>>) target_semaphore(%87 : memref<!tpu.dma_semaphore, #tpu.memory_space<semaphore_mem>>)
      %c5_i32 = arith.constant 5 : i32
      %88 = arith.addi %37, %c5_i32 : i32
      %89 = arith.addi %34, %88 : i32
      %90 = arith.index_cast %89 : i32 to index
      %91 = memref.load %arg2[%90] : memref<16xi32, #tpu.memory_space<smem>>
      %c0_i32_36 = arith.constant 0 : i32
      %92 = tpu.memref_slice %arg3[%91, %c0_i32_36] : memref<64x128xf32, #tpu.memory_space<any>> -> memref<1x128xf32, #tpu.memory_space<any>>
      %93 = tpu.memref_squeeze %92 : memref<1x128xf32, #tpu.memory_space<any>> -> memref<128xf32, #tpu.memory_space<any>>
      %c0_i32_37 = arith.constant 0 : i32
      %94 = tpu.memref_slice %arg5[%12, %88, %c0_i32_37] : memref<2x8x128xf32, #tpu.memory_space<vmem>> -> memref<1x1x128xf32, #tpu.memory_space<vmem>>
      %95 = tpu.memref_squeeze %94 : memref<1x1x128xf32, #tpu.memory_space<vmem>> -> memref<128xf32, #tpu.memory_space<vmem>>
      %96 = tpu.memref_slice %arg6[%12] : memref<2x!tpu.dma_semaphore, #tpu.memory_space<semaphore_mem>> -> memref<1x!tpu.dma_semaphore, #tpu.memory_space<semaphore_mem>>
      %97 = tpu.memref_squeeze %96 : memref<1x!tpu.dma_semaphore, #tpu.memory_space<semaphore_mem>> -> memref<!tpu.dma_semaphore, #tpu.memory_space<semaphore_mem>>
      tpu.enqueue_dma source(%93 : memref<128xf32, #tpu.memory_space<any>>) target(%95 : memref<128xf32, #tpu.memory_space<vmem>>) target_semaphore(%97 : memref<!tpu.dma_semaphore, #tpu.memory_space<semaphore_mem>>)
      %c6_i32 = arith.constant 6 : i32
      %98 = arith.addi %37, %c6_i32 : i32
      %99 = arith.addi %34, %98 : i32
      %100 = arith.index_cast %99 : i32 to index
      %101 = memref.load %arg2[%100] : memref<16xi32, #tpu.memory_space<smem>>
      %c0_i32_38 = arith.constant 0 : i32
      %102 = tpu.memref_slice %arg3[%101, %c0_i32_38] : memref<64x128xf32, #tpu.memory_space<any>> -> memref<1x128xf32, #tpu.memory_space<any>>
      %103 = tpu.memref_squeeze %102 : memref<1x128xf32, #tpu.memory_space<any>> -> memref<128xf32, #tpu.memory_space<any>>
      %c0_i32_39 = arith.constant 0 : i32
      %104 = tpu.memref_slice %arg5[%12, %98, %c0_i32_39] : memref<2x8x128xf32, #tpu.memory_space<vmem>> -> memref<1x1x128xf32, #tpu.memory_space<vmem>>
      %105 = tpu.memref_squeeze %104 : memref<1x1x128xf32, #tpu.memory_space<vmem>> -> memref<128xf32, #tpu.memory_space<vmem>>
      %106 = tpu.memref_slice %arg6[%12] : memref<2x!tpu.dma_semaphore, #tpu.memory_space<semaphore_mem>> -> memref<1x!tpu.dma_semaphore, #tpu.memory_space<semaphore_mem>>
      %107 = tpu.memref_squeeze %106 : memref<1x!tpu.dma_semaphore, #tpu.memory_space<semaphore_mem>> -> memref<!tpu.dma_semaphore, #tpu.memory_space<semaphore_mem>>
      tpu.enqueue_dma source(%103 : memref<128xf32, #tpu.memory_space<any>>) target(%105 : memref<128xf32, #tpu.memory_space<vmem>>) target_semaphore(%107 : memref<!tpu.dma_semaphore, #tpu.memory_space<semaphore_mem>>)
      %c7_i32 = arith.constant 7 : i32
      %108 = arith.addi %37, %c7_i32 : i32
      %109 = arith.addi %34, %108 : i32
      %110 = arith.index_cast %109 : i32 to index
      %111 = memref.load %arg2[%110] : memref<16xi32, #tpu.memory_space<smem>>
      %c0_i32_40 = arith.constant 0 : i32
      %112 = tpu.memref_slice %arg3[%111, %c0_i32_40] : memref<64x128xf32, #tpu.memory_space<any>> -> memref<1x128xf32, #tpu.memory_space<any>>
      %113 = tpu.memref_squeeze %112 : memref<1x128xf32, #tpu.memory_space<any>> -> memref<128xf32, #tpu.memory_space<any>>
      %c0_i32_41 = arith.constant 0 : i32
      %114 = tpu.memref_slice %arg5[%12, %108, %c0_i32_41] : memref<2x8x128xf32, #tpu.memory_space<vmem>> -> memref<1x1x128xf32, #tpu.memory_space<vmem>>
      %115 = tpu.memref_squeeze %114 : memref<1x1x128xf32, #tpu.memory_space<vmem>> -> memref<128xf32, #tpu.memory_space<vmem>>
      %116 = tpu.memref_slice %arg6[%12] : memref<2x!tpu.dma_semaphore, #tpu.memory_space<semaphore_mem>> -> memref<1x!tpu.dma_semaphore, #tpu.memory_space<semaphore_mem>>
      %117 = tpu.memref_squeeze %116 : memref<1x!tpu.dma_semaphore, #tpu.memory_space<semaphore_mem>> -> memref<!tpu.dma_semaphore, #tpu.memory_space<semaphore_mem>>
      tpu.enqueue_dma source(%113 : memref<128xf32, #tpu.memory_space<any>>) target(%115 : memref<128xf32, #tpu.memory_space<vmem>>) target_semaphore(%117 : memref<!tpu.dma_semaphore, #tpu.memory_space<semaphore_mem>>)
      %c1_i32_42 = arith.constant 1 : i32
    } else {
    }
    %c0_i32_10 = arith.constant 0 : i32
    %c0_i32_11 = arith.constant 0 : i32
    %20 = tpu.memref_slice %arg5[%12, %c0_i32_10, %c0_i32_11] : memref<2x8x128xf32, #tpu.memory_space<vmem>> -> memref<1x8x128xf32, #tpu.memory_space<vmem>>
    %21 = tpu.memref_squeeze %20 : memref<1x8x128xf32, #tpu.memory_space<vmem>> -> memref<8x128xf32, #tpu.memory_space<vmem>>
    %c0_i32_12 = arith.constant 0 : i32
    %c0_i32_13 = arith.constant 0 : i32
    %22 = tpu.memref_slice %arg5[%11, %c0_i32_12, %c0_i32_13] : memref<2x8x128xf32, #tpu.memory_space<vmem>> -> memref<1x8x128xf32, #tpu.memory_space<vmem>>
    %23 = tpu.memref_squeeze %22 : memref<1x8x128xf32, #tpu.memory_space<vmem>> -> memref<8x128xf32, #tpu.memory_space<vmem>>
    %24 = tpu.memref_slice %arg6[%11] : memref<2x!tpu.dma_semaphore, #tpu.memory_space<semaphore_mem>> -> memref<1x!tpu.dma_semaphore, #tpu.memory_space<semaphore_mem>>
    %25 = tpu.memref_squeeze %24 : memref<1x!tpu.dma_semaphore, #tpu.memory_space<semaphore_mem>> -> memref<!tpu.dma_semaphore, #tpu.memory_space<semaphore_mem>>
    tpu.wait_dma2 semaphore(%25 : memref<!tpu.dma_semaphore, #tpu.memory_space<semaphore_mem>>) src(%21 : memref<8x128xf32, #tpu.memory_space<vmem>>) dst(%23 : memref<8x128xf32, #tpu.memory_space<vmem>>)
    %26 = arith.index_cast %11 : i32 to index
    %c0 = arith.constant 0 : index
    %c0_14 = arith.constant 0 : index
    %27 = vector.load %arg5[%26, %c0, %c0_14] : memref<2x8x128xf32, #tpu.memory_space<vmem>>, vector<1x8x128xf32>
    %28 = vector.shape_cast %27 : vector<1x8x128xf32> to vector<8x128xf32>
    %cst = arith.constant 5.65685415 : f32
    %29 = vector.broadcast %cst : f32 to vector<8x128xf32>
    %30 = arith.mulf %28, %29 : vector<8x128xf32>
    %c0_15 = arith.constant 0 : index
    %c0_16 = arith.constant 0 : index
    %31 = vector.load %arg4[%c0_15, %c0_16] : memref<8x128xf32, #tpu.memory_space<vmem>>, vector<8x128xf32>
    tpu.vector_store %arg4[%c0_15, %c0_16], %30 {strides = array<i32>} : memref<8x128xf32, #tpu.memory_space<vmem>>, vector<8x128xf32>,
    return
  }
  func.func @transform_1(%arg0: i32, %arg1: i32, %arg2: memref<16xi32, #tpu.memory_space<smem>>) -> (i32, i32) {
    %c1_i32 = arith.constant 1 : i32
    %0 = arith.muli %arg0, %c1_i32 : i32
    %1 = arith.addi %0, %arg1 : i32
    %c0_i32 = arith.constant 0 : i32
    %c0_i32_0 = arith.constant 0 : i32
    return %1, %c0_i32 : i32, i32
  }
}

</mosaic_0001>

<bundles_post_ra>
// kernel: tpu_custom_call.1
= control target key start
LH: loop header
LB: loop body
LE: loop exit
PB: predicated region body
PF: predicated region fallthrough
CT: control target
= control target key end

     0   :  { %s1161_s0 = inlined_call_operand.hbm [shape: s32[16], index: 0, kind: input, shape index: {}]   ;;  %s1162_s1 = inlined_call_operand.hbm [shape: f32[64,128], index: 1, kind: input, shape index: {}]   ;;  %s1163_s2 = inlined_call_operand.hbm [shape: f32[16,128], index: 2, kind: output, shape index: {}]  }
   0x1   :  { %s610_s11 = scalar_lea.hbm %s1161_s0, 16 }
   0x2   :  { %p611_p0 = scmp.ne.s32.totalorder %s1161_s0, %s610_s11  ;;  %p614_p1 = scmp.lt.u32.totalorder %s610_s11, %s1161_s0 }
   0x4   :  { %p616_p2 = pnand %p614_p1, %p611_p0 }
   0x6   :  { %619 = shalt.err (!%p616_p2)  }
   0x7   :  { %s880_s16 = smov [#allocation5]  }
   0x8   :  { %8 = dma.hbm_to_smem %s1161_s0, 16, %s880_s16, [#allocation4] }
   0x9   :  { %856 = dma.done.wait [#allocation4], 16 }
   0xa   :  { %857 = vsyncadd [#allocation4], 4294967280 }
   0xb   :  { %10 = sfence }
   0xc   :  { %11 = vsyncpa [#allocation7], 0 }
   0xd   :  { %13 = vsyncpa [#allocation7 + $0x1], 0  ;;  %s917_s19 = smov 0   ;;  %s919_s20 = smov 0  }
   0xe   :  { %s921_s21 = smov 0   ;;  %s923_s22 = smov 0  }
   0xf LB: > { %s28_s0 = sadd.s32 1, %s874_s21  ;;  %s534_s23 = sadd.s32 4294967295, %s878_s22   ;;  %s878_s22 = sphi %s923_s22, %s19_s22   ;;  %s874_s21 = sphi %s921_s21, %s1172_s21   ;;  %s870_s20 = sphi %s919_s20, %s1174_s20   ;;  %s866_s19 = sphi %s917_s19, %s1173_s19  }
  0x10   : > { %p30_p3 = scmp.ge.s32.totalorder %s28_s0, 2  ;;  %p46_p4 = scmp.ne.s32.totalorder %s870_s20, %s866_s19 }
  0x11   : > { %s37_s24 = sadd.s32 1, %s870_s20  ;;  %p47_p5 = scmp.eq.s32.totalorder %s534_s23, 1 }
  0x12   : > { %s1176_s0 = smov (%p30_p3, %s28_s0), 0  ;;  %p41_p6 = scmp.eq.s32.totalorder %s878_s22, 1 }
  0x13   : > { %1166 = sst [smem:[#allocation45_spill]] %s1176_s0  ;;  %s34_s25 = ssub.s32 %s874_s21, %s1176_s0 }
  0x14   : > { %p35_p7 = scmp.eq.s32.totalorder %s34_s25, 0  ;;  %p535_p8 = scmp.ne.s32.totalorder %s34_s25, 0 }
  0x15   : > { %p947_p9 = por %p47_p5, %p46_p4  ;;  %p536_p11 = scmp.ge.s32.totalorder %s878_s22, 2 }
  0x16   : > { %s952_s27 = scalar_select %p35_p7, %s870_s20, %s37_s24  }
  0x17   : > { %p954_p10 = por %p535_p8, %p41_p6  ;;  %56 = sbr.rel (%p536_p11) target bundleno = 238 (0xee), region = 12 }
  0x18   : > { %1168 = sst [smem:[#allocation46_spill]] %s952_s27  ;;  %s1164_s29 = sand.u32 (!%p536_p11), 1, %s870_s20  }
  0x19   : > { %p83_p12 = scmp.lt.s32.totalorder (!%p536_p11), %s874_s21, 1  ;;  %s963_s30 = sshll.u32 (!%p536_p11), %s1164_s29, 3 }
  0x1a   : > { %s881_s3 = smov (!%p536_p11), [#allocation2]   ;;  %s882_s7 = smov (!%p536_p11), [#allocation2 + $0x1]  }
  0x1b   : > { %s99_s4 = sshll.u32 (!%p536_p11), %s881_s3, 4  ;;  %s116_s8 = sshll.u32 (!%p536_p11), %s882_s7, 4  ;;  %s966_s4 = int_to_ptr.vmem [resolvable:$true] %s99_s4  ;;  %s974_s8 = int_to_ptr.vmem [resolvable:$true] %s116_s8 }
  0x1c   : > { %s883_s14 = smov (!%p536_p11), [#allocation2 + $0x2]   ;;  %s884_s23 = smov (!%p536_p11), [#allocation2 + $0x3]  }
  0x1d   : > { %s133_s15 = sshll.u32 (!%p536_p11), %s883_s14, 4  ;;  %s984_s24 = sshll.u32 (!%p536_p11), %s884_s23, 4  ;;  %s979_s15 = int_to_ptr.vmem [resolvable:$true] %s133_s15  ;;  %s151_s24 = int_to_ptr.vmem [resolvable:$true] %s984_s24 }
  0x1e   : > { %s84_s5 = scalar_select %p83_p12, %s874_s21, 1 }
  0x1f   : > { %s993_s14 = scalar_lea.hbm %s1162_s1, 1024 }
  0x20   : > { %s968_s6 = sshll.u32 %s84_s5, 3 }
  0x21   : > { %s86_s9 = sld [smem:[#allocation5 + %s968_s6]]  ;;  %s103_s10 = sadd.s32 1, %s968_s6 }
  0x22   : > { %s972_s11 = sld [smem:[#allocation5 + %s103_s10]]  ;;  %s120_s12 = sadd.s32 2, %s968_s6 }
  0x23   : > { %s977_s13 = sld [smem:[#allocation5 + %s120_s12]]  ;;  %s137_s16 = sadd.s32 3, %s968_s6 }
  0x24   : > { %s982_s17 = sld [smem:[#allocation5 + %s137_s16]] }
  0x27   : > { %s539_s18 = sshll.u32 %s86_s9, 4 }
  0x28   : > { %s88_s5 = scalar_lea.hbm %s1162_s1, %s539_s18  ;;  %s540_s7 = sshll.u32 %s972_s11, 4 }
  0x29   : > { %s620_s10 = scalar_lea.hbm %s88_s5, 16  ;;  %p623_p0 = scmp.lt.u32.totalorder %s88_s5, %s1162_s1 }
  0x2a   : > { %p621_p13 = scmp.ne.s32.totalorder %s88_s5, %s620_s10  ;;  %p624_p1 = scmp.lt.u32.totalorder %s993_s14, %s620_s10 }
  0x2b   : > { %p626_p3 = scmp.lt.u32.totalorder %s620_s10, %s88_s5 }
  0x2c   : > { %p625_p2 = por %p624_p1, %p623_p0 }
  0x2e   : > { %p627_p4 = por %p626_p3, %p625_p2 }
  0x30   : > { %p628_p5 = pnand %p627_p4, %p621_p13 }
  0x32   : > { %631 = shalt.err (!%p628_p5)  }
  0x33   : > { %s632_s9 = scalar_lea.vmem %s966_s4, 16  ;;  %s1002_s29 = scalar_lea.vmem %s966_s4, 256 }
  0x34   : > { %p633_p6 = scmp.ne.s32.totalorder %s966_s4, %s632_s9  ;;  %p637_p7 = scmp.lt.s32.totalorder %s966_s4, %s966_s4 }
  0x35   : > { %p638_p8 = scmp.lt.s32.totalorder %s1002_s29, %s632_s9 }
  0x37   : > { %p639_p11 = por %p638_p8, %p637_p7 }
  0x39   : > { %p640_p12 = pnand %p639_p11, %p633_p6 }
  0x3b   : > { %643 = shalt.err (!%p640_p12)  }
  0x3c   : > { %102 = dma.hbm_to_vmem [thread:$0]  %s88_s5, 16, %s966_s4, [#allocation3] }
  0x3d   : > { %s106_s11 = scalar_lea.hbm %s1162_s1, %s540_s7  ;;  %s541_s16 = sshll.u32 %s977_s13, 4 }
  0x3e   : > { %s644_s18 = scalar_lea.hbm %s106_s11, 16  ;;  %p647_p0 = scmp.lt.u32.totalorder %s106_s11, %s1162_s1 }
  0x3f   : > { %p645_p13 = scmp.ne.s32.totalorder %s106_s11, %s644_s18  ;;  %p648_p1 = scmp.lt.u32.totalorder %s993_s14, %s644_s18 }
  0x40   : > { %p650_p3 = scmp.lt.u32.totalorder %s644_s18, %s106_s11 }
  0x41   : > { %p649_p2 = por %p648_p1, %p647_p0 }
  0x43   : > { %p651_p4 = por %p650_p3, %p649_p2 }
  0x45   : > { %p652_p5 = pnand %p651_p4, %p645_p13 }
  0x47   : > { %655 = shalt.err (!%p652_p5)  }
  0x48   : > { %s656_s3 = scalar_lea.vmem %s974_s8, 16  ;;  %p661_p7 = scmp.lt.s32.totalorder %s974_s8, %s966_s4 }
  0x49   : > { %p657_p6 = scmp.ne.s32.totalorder %s974_s8, %s656_s3  ;;  %p662_p8 = scmp.lt.s32.totalorder %s1002_s29, %s656_s3 }
  0x4b   : > { %p663_p11 = por %p662_p8, %p661_p7 }
  0x4d   : > { %p664_p12 = pnand %p663_p11, %p657_p6 }
  0x4f   : > { %667 = shalt.err (!%p664_p12)  }
  0x50   : > { %119 = dma.hbm_to_vmem [thread:$0]  %s106_s11, 16, %s974_s8, [#allocation3] }
  0x51   : > { %s123_s7 = scalar_lea.hbm %s1162_s1, %s541_s16  ;;  %s542_s10 = sshll.u32 %s982_s17, 4 }
  0x52   : > { %s668_s12 = scalar_lea.hbm %s123_s7, 16  ;;  %p671_p0 = scmp.lt.u32.totalorder %s123_s7, %s1162_s1 }
  0x53   : > { %p669_p13 = scmp.ne.s32.totalorder %s123_s7, %s668_s12  ;;  %p672_p1 = scmp.lt.u32.totalorder %s993_s14, %s668_s12 }
  0x54   : > { %p674_p3 = scmp.lt.u32.totalorder %s668_s12, %s123_s7 }
  0x55   : > { %p673_p2 = por %p672_p1, %p671_p0 }
  0x57   : > { %p675_p4 = por %p674_p3, %p673_p2 }
  0x59   : > { %p676_p5 = pnand %p675_p4, %p669_p13 }
  0x5b   : > { %679 = shalt.err (!%p676_p5)  }
  0x5c   : > { %s680_s8 = scalar_lea.vmem %s979_s15, 16  ;;  %p685_p7 = scmp.lt.s32.totalorder %s979_s15, %s966_s4 }
  0x5d   : > { %p681_p6 = scmp.ne.s32.totalorder %s979_s15, %s680_s8  ;;  %p686_p8 = scmp.lt.s32.totalorder %s1002_s29, %s680_s8 }
  0x5f   : > { %p687_p11 = por %p686_p8, %p685_p7 }
  0x61   : > { %p688_p12 = pnand %p687_p11, %p681_p6 }
  0x63   : > { %691 = shalt.err (!%p688_p12)  }
  0x64   : > { %136 = dma.hbm_to_vmem [thread:$0]  %s123_s7, 16, %s979_s15, [#allocation3] }
  0x65   : > { %s140_s11 = scalar_lea.hbm %s1162_s1, %s542_s10 }
  0x66   : > { %s692_s16 = scalar_lea.hbm %s140_s11, 16  ;;  %p695_p0 = scmp.lt.u32.totalorder %s140_s11, %s1162_s1 }
  0x67   : > { %p693_p13 = scmp.ne.s32.totalorder %s140_s11, %s692_s16  ;;  %p696_p1 = scmp.lt.u32.totalorder %s993_s14, %s692_s16 }
  0x68   : > { %p698_p3 = scmp.lt.u32.totalorder %s692_s16, %s140_s11 }
  0x69   : > { %p697_p2 = por %p696_p1, %p695_p0 }
  0x6b   : > { %p699_p4 = por %p698_p3, %p697_p2 }
  0x6d   : > { %p700_p5 = pnand %p699_p4, %p693_p13 }
  0x6f   : > { %703 = shalt.err (!%p700_p5)  }
  0x70   : > { %s704_s25 = scalar_lea.vmem %s151_s24, 16  ;;  %p709_p7 = scmp.lt.s32.totalorder %s151_s24, %s966_s4 }
  0x71   : > { %p705_p6 = scmp.ne.s32.totalorder %s151_s24, %s704_s25  ;;  %p710_p8 = scmp.lt.s32.totalorder %s1002_s29, %s704_s25 }
  0x73   : > { %p711_p11 = por %p710_p8, %p709_p7 }
  0x75   : > { %p712_p12 = pnand %p711_p11, %p705_p6 }
  0x77   : > { %715 = shalt.err (!%p712_p12)  }
  0x78   : > { %153 = dma.hbm_to_vmem [thread:$0]  %s140_s11, 16, %s151_s24, [#allocation3] }
  0x79   : > { %s154_s15 = sadd.s32 4, %s968_s6  ;;  %s885_s13 = smov [#allocation2 + $0x4]  }
  0x7a   : > { %s155_s3 = sld [smem:[#allocation5 + %s154_s15]]  ;;  %s167_s5 = sshll.u32 %s885_s13, 4  ;;  %s1047_s5 = int_to_ptr.vmem [resolvable:$true] %s167_s5 }
  0x7b   : > { %s171_s7 = sadd.s32 5, %s968_s6  ;;  %s886_s12 = smov [#allocation2 + $0x5]  }
  0x7c   : > { %s1050_s10 = sld [smem:[#allocation5 + %s171_s7]]  ;;  %s184_s9 = sshll.u32 %s886_s12, 4  ;;  %s1053_s9 = int_to_ptr.vmem [resolvable:$true] %s184_s9 }
  0x7d   : > { %s188_s0 = sadd.s32 6, %s968_s6  ;;  %s205_s8 = sadd.s32 7, %s968_s6 }
  0x7e   : > { %s1055_s24 = sld [smem:[#allocation5 + %s188_s0]]  ;;  %s887_s27 = smov [#allocation2 + $0x6]  }
  0x7f   : > { %s201_s11 = sshll.u32 %s887_s27, 4  ;;  %s1061_s11 = int_to_ptr.vmem [resolvable:$true] %s201_s11 }
  0x80   : > { %s543_s17 = sshll.u32 %s155_s3, 4 }
  0x81   : > { %s157_s23 = scalar_lea.hbm %s1162_s1, %s543_s17 }
  0x82   : > { %s716_s25 = scalar_lea.hbm %s157_s23, 16  ;;  %p719_p0 = scmp.lt.u32.totalorder %s157_s23, %s1162_s1 }
  0x83   : > { %p717_p13 = scmp.ne.s32.totalorder %s157_s23, %s716_s25  ;;  %p720_p1 = scmp.lt.u32.totalorder %s993_s14, %s716_s25 }
  0x84   : > { %p722_p3 = scmp.lt.u32.totalorder %s716_s25, %s157_s23 }
  0x85   : > { %p721_p2 = por %p720_p1, %p719_p0 }
  0x87   : > { %p723_p4 = por %p722_p3, %p721_p2 }
  0x89   : > { %p724_p5 = pnand %p723_p4, %p717_p13 }
  0x8b   : > { %727 = shalt.err (!%p724_p5)  }
  0x8c   : > { %s728_s6 = scalar_lea.vmem %s1047_s5, 16  ;;  %p733_p7 = scmp.lt.s32.totalorder %s1047_s5, %s966_s4 }
  0x8d   : > { %p729_p6 = scmp.ne.s32.totalorder %s1047_s5, %s728_s6  ;;  %p734_p8 = scmp.lt.s32.totalorder %s1002_s29, %s728_s6 }
  0x8f   : > { %p735_p11 = por %p734_p8, %p733_p7 }
  0x91   : > { %p736_p12 = pnand %p735_p11, %p729_p6 }
  0x93   : > { %739 = shalt.err (!%p736_p12)  }
  0x94   : > { %170 = dma.hbm_to_vmem [thread:$0]  %s157_s23, 16, %s1047_s5, [#allocation3] }
  0x95   : > { %s544_s3 = sshll.u32 %s1050_s10, 4  ;;  %s1074_s7 = sld [smem:[#allocation5 + %s205_s8]] }
  0x96   : > { %s174_s17 = scalar_lea.hbm %s1162_s1, %s544_s3  ;;  %s545_s27 = sshll.u32 %s1055_s24, 4 }
  0x97   : > { %s740_s16 = scalar_lea.hbm %s174_s17, 16  ;;  %p743_p0 = scmp.lt.u32.totalorder %s174_s17, %s1162_s1 }
  0x98   : > { %p741_p13 = scmp.ne.s32.totalorder %s174_s17, %s740_s16  ;;  %p744_p1 = scmp.lt.u32.totalorder %s993_s14, %s740_s16 }
  0x99   : > { %p746_p3 = scmp.lt.u32.totalorder %s740_s16, %s174_s17 }
  0x9a   : > { %p745_p2 = por %p744_p1, %p743_p0 }
  0x9c   : > { %p747_p4 = por %p746_p3, %p745_p2 }
  0x9e   : > { %p748_p5 = pnand %p747_p4, %p741_p13 }
  0xa0   : > { %751 = shalt.err (!%p748_p5)  }
  0xa1   : > { %s752_s5 = scalar_lea.vmem %s1053_s9, 16  ;;  %p757_p7 = scmp.lt.s32.totalorder %s1053_s9, %s966_s4 }
  0xa2   : > { %p753_p6 = scmp.ne.s32.totalorder %s1053_s9, %s752_s5  ;;  %p758_p8 = scmp.lt.s32.totalorder %s1002_s29, %s752_s5 }
  0xa4   : > { %p759_p11 = por %p758_p8, %p757_p7 }
  0xa6   : > { %p760_p12 = pnand %p759_p11, %p753_p6 }
  0xa8   : > { %763 = shalt.err (!%p760_p12)  }
  0xa9   : > { %187 = dma.hbm_to_vmem [thread:$0]  %s174_s17, 16, %s1053_s9, [#allocation3] }
  0xaa   : > { %s191_s8 = scalar_lea.hbm %s1162_s1, %s545_s27 }
  0xab   : > { %s764_s23 = scalar_lea.hbm %s191_s8, 16  ;;  %p767_p0 = scmp.lt.u32.totalorder %s191_s8, %s1162_s1 }
  0xac   : > { %p765_p13 = scmp.ne.s32.totalorder %s191_s8, %s764_s23  ;;  %p768_p1 = scmp.lt.u32.totalorder %s993_s14, %s764_s23 }
  0xad   : > { %p770_p3 = scmp.lt.u32.totalorder %s764_s23, %s191_s8 }
  0xae   : > { %p769_p2 = por %p768_p1, %p767_p0 }
  0xb0   : > { %p771_p4 = por %p770_p3, %p769_p2 }
  0xb2   : > { %p772_p5 = pnand %p771_p4, %p765_p13 }
  0xb4   : > { %775 = shalt.err (!%p772_p5)  }
  0xb5   : > { %s776_s9 = scalar_lea.vmem %s1061_s11, 16  ;;  %p781_p7 = scmp.lt.s32.totalorder %s1061_s11, %s966_s4 }
  0xb6   : > { %p777_p6 = scmp.ne.s32.totalorder %s1061_s11, %s776_s9  ;;  %p782_p8 = scmp.lt.s32.totalorder %s1002_s29, %s776_s9 }
  0xb8   : > { %p783_p11 = por %p782_p8, %p781_p7 }
  0xba   : > { %p784_p12 = pnand %p783_p11, %p777_p6 }
  0xbc   : > { %787 = shalt.err (!%p784_p12)  }
  0xbd   : > { %204 = dma.hbm_to_vmem [thread:$0]  %s191_s8, 16, %s1061_s11, [#allocation3] }
  0xbe   : > { %s888_s6 = smov [#allocation2 + $0x7]   ;;  %s546_s12 = sshll.u32 %s1074_s7, 4 }
  0xbf   : > { %s218_s3 = sshll.u32 %s888_s6, 4  ;;  %s208_s27 = scalar_lea.hbm %s1162_s1, %s546_s12  ;;  %s219_s3 = int_to_ptr.vmem [resolvable:$true] %s218_s3 }
  0xc0   : > { %s788_s16 = scalar_lea.hbm %s208_s27, 16  ;;  %p791_p0 = scmp.lt.u32.totalorder %s208_s27, %s1162_s1 }
  0xc1   : > { %p789_p13 = scmp.ne.s32.totalorder %s208_s27, %s788_s16  ;;  %p792_p1 = scmp.lt.u32.totalorder %s993_s14, %s788_s16 }
  0xc2   : > { %p794_p3 = scmp.lt.u32.totalorder %s788_s16, %s208_s27 }
  0xc3   : > { %p793_p2 = por %p792_p1, %p791_p0 }
  0xc5   : > { %p795_p4 = por %p794_p3, %p793_p2 }
  0xc7   : > { %p796_p5 = pnand %p795_p4, %p789_p13 }
  0xc9   : > { %799 = shalt.err (!%p796_p5)  }
  0xca   : > { %s800_s11 = scalar_lea.vmem %s219_s3, 16  ;;  %p805_p7 = scmp.lt.s32.totalorder %s219_s3, %s966_s4 }
  0xcb   : > { %p801_p6 = scmp.ne.s32.totalorder %s219_s3, %s800_s11  ;;  %p806_p8 = scmp.lt.s32.totalorder %s1002_s29, %s800_s11 }
  0xcd   : > { %p807_p11 = por %p806_p8, %p805_p7 }
  0xcf   : > { %p808_p12 = pnand %p807_p11, %p801_p6 }
  0xd1   : > { %811 = shalt.err (!%p808_p12)  }
  0xd2   : > { %221 = dma.hbm_to_vmem [thread:$0]  %s208_s27, 16, %s219_s3, [#allocation3] }
  0xd3   : > { %s63_s7 = scalar_lea.vmem [#allocation6], %s963_s30 }
  0xd4   : > { %858 = dma.done.wait [#allocation3], 128 }
  0xd5   : > { %859 = vsyncadd [#allocation3], 4294967168  ;;  %s557_s14 = sshll.u32 %s874_s21, 7  ;;  %s391_s5 = sshll.u32 %s63_s7, 4  ;;  %v373_v0 = vld [vmem:[#allocation2] sm:$0xff]  ;;  %s1120_s5 = int_to_ptr.vmem [resolvable:$true] %s391_s5 }
  0xd6   : > { %v374_v1 = vmul.f32 5.656854, %v373_v0  ;;  %s1118_s4 = scalar_lea.hbm %s1163_s2, %s557_s14  ;;  %s1170_s30 = sand.u32 1, %s870_s20  }
  0xd7   : > { %s377_s29 = scalar_lea.sflag [#allocation7], %s1170_s30  ;;  %s812_s8 = scalar_lea.vmem %s1120_s5, 128 }
  0xd8   : > { %375 = vst [vmem:[%s63_s7] sm:$0xff] %v374_v1  ;;  %p813_p13 = scmp.ne.s32.totalorder %s1120_s5, %s812_s8  ;;  %s889_s21 = smov [#allocation6]  }
  0xd9   : > { %s816_s23 = sshll.u32 %s889_s21, 4  ;;  %s817_s23 = int_to_ptr.vmem [resolvable:$false] %s816_s23 }
  0xda   : > { %p814_p0 = pnand %p813_p13, %p954_p10  ;;  %s818_s15 = scalar_lea.vmem %s817_s23, 256 }
  0xdb   : > { %p819_p2 = scmp.lt.s32.totalorder %s1120_s5, %s817_s23  ;;  %p820_p3 = scmp.lt.s32.totalorder %s818_s15, %s812_s8 }
  0xdc   : > { %p815_p1 = pneg %p814_p0 }
  0xdd   : > { %p821_p4 = por %p820_p3, %p819_p2 }
  0xdf   : > { %p822_p5 = pnand %p821_p4, %p815_p1 }
  0xe1   : > { %825 = shalt.err (!%p822_p5)
}
  0xe2   : > { %s826_s13 = scalar_lea.hbm %s1118_s4, 128  ;;  %s830_s3 = scalar_lea.hbm %s1163_s2, 256 }
  0xe3   : > { %p827_p6 = scmp.ne.s32.totalorder %s1118_s4, %s826_s13  ;;  %p831_p11 = scmp.lt.u32.totalorder %s1118_s4, %s1163_s2 }
  0xe4   : > { %p832_p12 = scmp.lt.u32.totalorder %s830_s3, %s826_s13  ;;  %p834_p0 = scmp.lt.u32.totalorder %s826_s13, %s1118_s4 }
  0xe5   : > { %p828_p7 = pnand %p827_p6, %p954_p10 }
  0xe6   : > { %p833_p13 = por %p832_p12, %p831_p11 }
  0xe7   : > { %p829_p8 = pneg %p828_p7 }
  0xe8   : > { %p835_p1 = por %p834_p0, %p833_p13 }
  0xea   : > { %p836_p2 = pnand %p835_p1, %p829_p8 }
  0xec   : > { %839 = shalt.err (!%p836_p2)
}
  0xed   : > { %562 = dma.vmem_to_hbm [thread:$0]  (%p954_p10), %s1120_s5, 128, %s1118_s4, %s377_s29  }
  0xee PF: > { %p568_p3 = scmp.ge.s32.totalorder %s878_s22, 1  ;;  %s403_s17 = sand.u32 1, %s866_s19  }
  0xef   : > { %s404_s27 = scalar_lea.sflag [#allocation7], %s403_s17 }
  0xf0   : > { %p565_p4 = pnand %p568_p3, %p947_p9 }
  0xf2   : > { %861 = dma.done.wait (!%p565_p4), %s404_s27, 128  }
  0xf3   : > { %863 = vsyncadd (!%p565_p4), %s404_s27, 4294967168  ;;  %s19_s22 = sadd.s32 1, %s878_s22   ;;  %s1171_s16 = sld [smem:[#allocation46_spill]] }
  0xf4   : > { %p16_p5 = scmp.ge.s32.totalorder %s19_s22, 3   ;;  %s1172_s21 = sld [smem:[#allocation45_spill]] }
  0xf5   : > { %s1173_s19 = smov %s870_s20 }
  0xf6   :  { %18 = sbr.rel (!%p16_p5) target bundleno = 15 (0xf), region = 153 }
  0xf9   : > { %s1174_s20 = smov %s1171_s16 }
  0xfd   :  { %409 = vsyncpa [#allocation7], 1 }
  0xfe   :  { %411 = vsyncpa [#allocation7 + $0x1], 1 }
  0xff   :  { %412 = vsyncmov [#allocation3] }
 0x102   :  { %s413_s26 = vpop.sfrf %412 }
 0x103   :  { %p560_p9 = scmp.ne.s32.totalorder %s413_s26, 0 }
 0x105   :  { %417 = shalt.err (%p560_p9)  }
 0x106   :  { %419 = vsyncmov [#allocation3 + $0x1] }
 0x109   :  { %s420_s28 = vpop.sfrf %419 }
 0x10a   :  { %p561_p10 = scmp.ne.s32.totalorder %s420_s28, 0 }
 0x10c   :  { %424 = shalt.err (%p561_p10)  }

</bundles_post_ra>
